<compile_context>
chip_gen: v7x
topology: tpu7x:2x2x1
jax: 0.10.0
libtpu: 0.0.40
codegen_flags: <defaults>
</compile_context>

<pallas_src>
import jax
import jax.numpy as jnp
from jax.experimental import pallas as pl
from jax.experimental.pallas import tpu as pltpu

_LANE = 128
_SUBLANE = 8


def _round_up(v, m):
    return (v + m - 1) // m * m


def _prod(xs):
    p = 1
    for v in xs:
        p *= int(v)
    return p


def _kron_factors(factor_list):
    """Row-major Kronecker product of a list of (dim_i, rank_i) matrices.

    Result[(i0..im) row-major, (a0..am) row-major] = prod_j F_j[i_j, a_j],
    matching a row-major flatten of the corresponding tensor modes.
    """
    out = factor_list[0]
    for f in factor_list[1:]:
        out = jnp.einsum("ka,lb->klab", out, f).reshape(
            out.shape[0] * f.shape[0], out.shape[1] * f.shape[1]
        )
    return out


def _vmem_budget_bytes():
    """Per-kernel VMEM budget derived from the chip.

    v5e/v6e have 128 MiB physical VMEM -> 64 MiB budget; v7x has 64 MiB per
    TensorCore -> 32 MiB budget.  Falls back to the conservative 32 MiB figure
    when the hardware query is unavailable.
    """
    phys = None
    try:
        info = pltpu.get_tpu_info()
        phys = getattr(info, "vmem_capacity_bytes", None)
    except Exception:
        phys = None
    if not phys:
        phys = 64 * 2**20  # conservative: v7x per-core figure
    return int(min(int(phys) // 2, 64 * 2**20))


# ----------------------------------------------------------------------------
# Kernels
# ----------------------------------------------------------------------------
def _trl_kernel_single(x_ref, fin_ref, wout_ref, b_ref, o_ref):
    """Whole-K fast path for one batch tile: y = (x @ F_in) @ W_out + bias.

    x_ref    : (tb, K)        bf16 VMEM
    fin_ref  : (K, R_pad)     bf16 VMEM (resident, constant index_map)
    wout_ref : (R_pad, O_pad) bf16 VMEM (resident)
    b_ref    : (1,)           f32  SMEM
    o_ref    : (tb, O_pad)    f32  VMEM
    """
    z = jnp.dot(x_ref[...], fin_ref[...], preferred_element_type=jnp.float32)
    y = jnp.dot(z, wout_ref[...].astype(jnp.float32),
                preferred_element_type=jnp.float32)
    o_ref[...] = (y + b_ref[0]).astype(o_ref.dtype)


def _make_trl_kernel_tiled(tk, fin_resident):
    """K-tiled path: accumulate x @ F_in over K tiles in a f32 VMEM scratch."""

    def kernel(x_ref, fin_ref, wout_ref, b_ref, o_ref, z_ref):
        k = pl.program_id(1)

        @pl.when(k == 0)
        def _init():
            z_ref[...] = jnp.zeros_like(z_ref)

        if fin_resident:
            # F_in lives fully in VMEM; slice the current K window in-place.
            off = pl.multiple_of(k * tk, tk)
            fin_blk = fin_ref[pl.ds(off, tk), :]
        else:
            fin_blk = fin_ref[...]

        z_ref[...] += jnp.dot(x_ref[...], fin_blk,
                              preferred_element_type=jnp.float32)

        @pl.when(k == pl.num_programs(1) - 1)
        def _finalize():
            y = jnp.dot(z_ref[...], wout_ref[...].astype(jnp.float32),
                        preferred_element_type=jnp.float32)
            o_ref[...] = (y + b_ref[0]).astype(o_ref.dtype)

    return kernel


# ----------------------------------------------------------------------------
# Wrapper
# ----------------------------------------------------------------------------
def trl_forward(x, core, factors, bias, output_size, *, dot_dtype=jnp.bfloat16):
    """TRL forward: Tucker-factored contraction of x with the regression weight, plus bias.

    dot_dtype is the precision of the streamed operands (x, F_in, W_out);
    accumulation is always f32 on the MXU.
    """
    B = int(x.shape[0])
    in_modes = tuple(int(d) for d in x.shape[1:])
    out_modes = tuple(int(d) for d in output_size[1:])
    n_in_modes = len(in_modes)
    K = _prod(in_modes)
    O = _prod(out_modes)

    in_factors = list(factors[:n_in_modes])
    out_factors = list(factors[n_in_modes:])

    # --- parameter-only glue (tiny): combined input factor & core/output projection ---
    F_in = _kron_factors(in_factors)                      # (K, R)
    R = int(F_in.shape[1])
    if out_factors:
        F_out = _kron_factors(out_factors)                # (O, prod(out ranks))
    else:
        F_out = jnp.ones((1, 1), core.dtype)
    W_out = core.reshape(R, -1) @ F_out.T                 # (R, O)

    R_pad = _round_up(R, _LANE)
    O_pad = _round_up(O, _LANE)

    bpe = jnp.dtype(dot_dtype).itemsize
    budget = _vmem_budget_bytes()

    # --- batch tiling ---
    if B % _SUBLANE == 0 or B <= 256:
        B_rows = B                       # no row padding needed
    else:
        B_rows = _round_up(B, _SUBLANE)  # large ragged batch: pad rows
    if B_rows % _SUBLANE == 0:
        tb = next(c for c in (256, 128, 64, 32, 16, 8) if B_rows % c == 0)
    else:
        tb = B_rows                      # single ragged tile (block == full dim)
    # Give a second batch tile when there would be only one, so both v7x
    # TensorCores get work (costs only ~one extra grid step on 1-TC chips).
    if B_rows // tb == 1 and B_rows >= 16 and B_rows % 16 == 0:
        tb = B_rows // 2
    n_b = B_rows // tb

    # VMEM that does not depend on the K tiling: resident W_out (double-buffered
    # allocation), output block, z accumulator.
    fixed = 2 * R_pad * O_pad * bpe + 2 * tb * O_pad * 4 + tb * R_pad * 4

    # --- K tiling: prefer a single step; else keep F_in resident and stream
    # only x; last resort stream both. ---
    single_cost = fixed + 2 * tb * K * bpe + 2 * K * R_pad * bpe
    if single_cost <= budget:
        single = True
        fin_resident = True
        tk, n_k, K_pad = K, 1, K
        vmem_est = single_cost
    else:
        single = False
        K_lane = _round_up(K, _LANE)
        fin_res_bytes = 2 * K_lane * R_pad * bpe
        fin_resident = (fixed + fin_res_bytes) <= int(0.6 * budget)
        tk = _LANE
        for cand in (4096, 2048, 1024, 512, 256, 128):
            if cand > K_lane:
                continue
            if fin_resident:
                cost = fixed + fin_res_bytes + 2 * tb * cand * bpe
            else:
                cost = fixed + 3 * cand * R_pad * bpe + 2 * tb * cand * bpe
            if cost <= budget:
                tk = cand
                break
        K_pad = _round_up(K, tk)
        n_k = K_pad // tk
        if fin_resident:
            vmem_est = fixed + 2 * K_pad * R_pad * bpe + 2 * tb * tk * bpe
        else:
            vmem_est = fixed + 3 * tk * R_pad * bpe + 2 * tb * tk * bpe

    # --- operands: avoid the padded HBM round-trip for x when already aligned ---
    x_flat = x.reshape(B, K)
    if B_rows == B and K_pad == K:
        x_in = x_flat.astype(dot_dtype)
    else:
        x_in = (jnp.zeros((B_rows, K_pad), dot_dtype)
                .at[:B, :K].set(x_flat.astype(dot_dtype)))

    if K_pad == K and R_pad == R:
        fin_p = F_in.astype(dot_dtype)
    else:
        fin_p = (jnp.zeros((K_pad, R_pad), dot_dtype)
                 .at[:K, :R].set(F_in.astype(dot_dtype)))
    if R_pad == R and O_pad == O:
        wout_p = W_out.astype(dot_dtype)
    else:
        wout_p = (jnp.zeros((R_pad, O_pad), dot_dtype)
                  .at[:R, :O].set(W_out.astype(dot_dtype)))
    bias_s = bias.reshape((1,)).astype(jnp.float32)

    # --- cost / limits ---
    flops = 2 * B_rows * K_pad * R_pad + 2 * B_rows * R_pad * O_pad
    fin_passes = 1 if fin_resident else n_b
    bytes_accessed = (
        B_rows * K_pad * bpe
        + fin_passes * K_pad * R_pad * bpe
        + R_pad * O_pad * bpe
        + B_rows * O_pad * 4
    )
    # Never clamp below the actual estimated requirement.
    vmem_limit = int(min(max(int(1.25 * vmem_est), 16 * 2**20), 2 * budget))

    # --- grid / specs ---
    if single:
        grid_spec = pltpu.PrefetchScalarGridSpec(
            num_scalar_prefetch=0,
            grid=(n_b,),
            in_specs=[
                pl.BlockSpec((tb, K_pad), lambda ib: (ib, 0)),       # x block
                pl.BlockSpec((K_pad, R_pad), lambda ib: (0, 0)),     # F_in, resident
                pl.BlockSpec((R_pad, O_pad), lambda ib: (0, 0)),     # W_out, resident
                pl.BlockSpec(memory_space=pltpu.SMEM),               # scalar bias
            ],
            out_specs=pl.BlockSpec((tb, O_pad), lambda ib: (ib, 0)),
        )
        kernel = _trl_kernel_single
        dim_sem = ("parallel",)
    else:
        if fin_resident:
            fin_spec = pl.BlockSpec((K_pad, R_pad), lambda ib, k: (0, 0))
        elif n_k > 2:
            fin_spec = pl.BlockSpec((tk, R_pad), lambda ib, k: (k, 0),
                                    pipeline_mode=pl.Buffered(3))
        else:
            fin_spec = pl.BlockSpec((tk, R_pad), lambda ib, k: (k, 0))
        grid_spec = pltpu.PrefetchScalarGridSpec(
            num_scalar_prefetch=0,
            grid=(n_b, n_k),
            in_specs=[
                pl.BlockSpec((tb, tk), lambda ib, k: (ib, k)),        # x block
                fin_spec,                                             # F_in
                pl.BlockSpec((R_pad, O_pad), lambda ib, k: (0, 0)),   # W_out, resident
                pl.BlockSpec(memory_space=pltpu.SMEM),                # scalar bias
            ],
            out_specs=pl.BlockSpec((tb, O_pad), lambda ib, k: (ib, 0)),
            scratch_shapes=[pltpu.VMEM((tb, R_pad), jnp.float32)],
        )
        kernel = _make_trl_kernel_tiled(tk, fin_resident)
        dim_sem = ("parallel", "arbitrary")

    y_pad = pl.pallas_call(
        kernel,
        out_shape=jax.ShapeDtypeStruct((B_rows, O_pad), jnp.float32),
        grid_spec=grid_spec,
        compiler_params=pltpu.CompilerParams(
            dimension_semantics=dim_sem,
            vmem_limit_bytes=vmem_limit,
        ),
        cost_estimate=pl.CostEstimate(
            flops=int(flops), transcendentals=0,
            bytes_accessed=int(bytes_accessed)),
    )(x_in, fin_p, wout_p, bias_s)

    y = y_pad[:B, :O]
    return y.reshape((B,) + out_modes).astype(x.dtype)


if __name__ == "__main__":
    # Small shapes consistent with the module:
    #   input_size  = (2, 4, 16, 16)   (NCHW)
    #   output_size = (2, 10)
    #   ranks       = (3, 4, 4, 5)  over weight_size = [4, 16, 16, 10]
    input_size = (2, 4, 16, 16)
    output_size = (2, 10)
    ranks = (3, 4, 4, 5)
    weight_size = list(input_size[1:]) + list(output_size[1:])

    key = jax.random.PRNGKey(0)
    k_x, k_core, *k_factors = jax.random.split(key, 2 + len(weight_size))

    # uniform_(-0.1, 0.1) init for core/factors; bias stays zero, matching the
    # PyTorch __init__ (tl.zeros(1) is never re-initialized).
    core = jax.random.uniform(k_core, ranks, dtype=jnp.float32, minval=-0.1, maxval=0.1)
    factors = [
        jax.random.uniform(kf, (in_size, rank), dtype=jnp.float32, minval=-0.1, maxval=0.1)
        for kf, in_size, rank in zip(k_factors, weight_size, ranks)
    ]
    bias = jnp.zeros((1,), dtype=jnp.float32)

    x = jax.random.normal(k_x, input_size, dtype=jnp.float32)

    y = trl_forward(x, core, factors, bias, output_size)
    y = jax.block_until_ready(y)

    # Pure-JAX reference of the ORIGINAL dense-weight semantics
    # (validates both the Tucker factorization path and the kernel).
    W_ref = jnp.einsum("abcd,ia,jb,kc,ld->ijkl", core, *factors)
    y_ref = x.reshape(input_size[0], -1) @ W_ref.reshape(-1, output_size[1]) + bias[0]

    assert y.shape == (input_size[0], output_size[1])
    err = float(jnp.max(jnp.abs(y - y_ref)))
    assert jnp.allclose(y, y_ref, atol=1e-4, rtol=1e-3), f"max abs err {err}"

    # TODO(synk): TRL.penalty (parameter-norm regularizer) is training-time only
    # and is not part of the forward pass, so it is left to plain JAX.
    print("KERNEL_OK")
</pallas_src>

<mosaic_0001>
module attributes {stable_mosaic.version = 11 : i64} {
  func.func @_trl_kernel_single(%arg0: i32, %arg1: memref<2x1024xbf16, #tpu.memory_space<vmem>>, %arg2: memref<1024x128xbf16, #tpu.memory_space<vmem>>, %arg3: memref<128x128xbf16, #tpu.memory_space<vmem>>, %arg4: memref<1xf32, #tpu.memory_space<smem>>, %arg5: memref<2x128xf32, #tpu.memory_space<vmem>>) attributes {dimension_semantics = [#tpu.dimension_semantics<parallel>], iteration_bounds = array<i64: 1>, scalar_prefetch = 0 : i64, scratch_operands = 0 : i64, tpu.core_type = #tpu.core_type<tc>, window_params = [{transform_indices = @transform_0, window_bounds = array<i64: 2, 1024>}, {pipeline_mode = #tpu.pipeline_mode<synchronous>, transform_indices = @transform_1, window_bounds = array<i64: 1024, 128>}, {pipeline_mode = #tpu.pipeline_mode<synchronous>, transform_indices = @transform_2, window_bounds = array<i64: 128, 128>}, {transform_indices = @transform_3, window_bounds = array<i64: 1>}, {transform_indices = @transform_4, window_bounds = array<i64: 2, 128>}]} {
    %c0 = arith.constant 0 : index
    %c0_0 = arith.constant 0 : index
    %0 = vector.load %arg1[%c0, %c0_0] : memref<2x1024xbf16, #tpu.memory_space<vmem>>, vector<2x1024xbf16>
    %c0_1 = arith.constant 0 : index
    %c0_2 = arith.constant 0 : index
    %1 = vector.load %arg2[%c0_1, %c0_2] : memref<1024x128xbf16, #tpu.memory_space<vmem>>, vector<1024x128xbf16>
    %cst = arith.constant dense<0.000000e+00> : vector<2x128xf32>
    %2 = tpu.matmul %0, %1, %cst {dimension_numbers = #tpu.dot_dimension_numbers<[1], [0], [0], [1], [0, 0, 1, 1], [], []>} : vector<2x1024xbf16>, vector<1024x128xbf16>, vector<2x128xf32> -> vector<2x128xf32>
    %c0_3 = arith.constant 0 : index
    %c0_4 = arith.constant 0 : index
    %3 = vector.load %arg3[%c0_3, %c0_4] : memref<128x128xbf16, #tpu.memory_space<vmem>>, vector<128x128xbf16>
    %4 = arith.extf %3 : vector<128x128xbf16> to vector<128x128xf32>
    %cst_5 = arith.constant dense<0.000000e+00> : vector<2x128xf32>
    %5 = tpu.matmul %2, %4, %cst_5 {dimension_numbers = #tpu.dot_dimension_numbers<[1], [0], [0], [1], [0, 0, 1, 1], [], []>} : vector<2x128xf32>, vector<128x128xf32>, vector<2x128xf32> -> vector<2x128xf32>
    %c0_6 = arith.constant 0 : index
    %6 = memref.load %arg4[%c0_6] : memref<1xf32, #tpu.memory_space<smem>>
    %7 = vector.broadcast %6 : f32 to vector<2x128xf32>
    %8 = arith.addf %5, %7 : vector<2x128xf32>
    %c0_7 = arith.constant 0 : index
    %c0_8 = arith.constant 0 : index
    %9 = vector.load %arg5[%c0_7, %c0_8] : memref<2x128xf32, #tpu.memory_space<vmem>>, vector<2x128xf32>
    tpu.vector_store %arg5[%c0_7, %c0_8], %8 {strides = array<i32>} : memref<2x128xf32, #tpu.memory_space<vmem>>, vector<2x128xf32>,
    return
  }
  func.func @transform_0(%arg0: i32) -> (i32, i32) {
    %c0_i32 = arith.constant 0 : i32
    %c0_i32_0 = arith.constant 0 : i32
    return %arg0, %c0_i32 : i32, i32
  }
  func.func @transform_1(%arg0: i32) -> (i32, i32) {
    %c0_i32 = arith.constant 0 : i32
    %c0_i32_0 = arith.constant 0 : i32
    %c0_i32_1 = arith.constant 0 : i32
    return %c0_i32, %c0_i32_0 : i32, i32
  }
  func.func @transform_2(%arg0: i32) -> (i32, i32) {
    %c0_i32 = arith.constant 0 : i32
    %c0_i32_0 = arith.constant 0 : i32
    %c0_i32_1 = arith.constant 0 : i32
    return %c0_i32, %c0_i32_0 : i32, i32
  }
  func.func @transform_3(%arg0: i32) -> i32 {
    %c0_i32 = arith.constant 0 : i32
    %c0_i32_0 = arith.constant 0 : i32
    return %c0_i32 : i32
  }
  func.func @transform_4(%arg0: i32) -> (i32, i32) {
    %c0_i32 = arith.constant 0 : i32
    %c0_i32_0 = arith.constant 0 : i32
    return %arg0, %c0_i32 : i32, i32
  }
}

</mosaic_0001>

<bundles_post_ra>
// kernel: tpu_custom_call.1
= control target key start
LH: loop header
LB: loop body
LE: loop exit
PB: predicated region body
PF: predicated region fallthrough
CT: control target
= control target key end

     0   :  { %10 = vsyncpa [#allocation4], 0  ;;  %s1452_s0 = inlined_call_operand.hbm [shape: bf16[2,1024], index: 0, kind: input, shape index: {}]   ;;  %s1453_s1 = inlined_call_operand.hbm [shape: bf16[1024,128], index: 1, kind: input, shape index: {}]   ;;  %s1454_s2 = inlined_call_operand.hbm [shape: bf16[128,128], index: 2, kind: input, shape index: {}]   ;;  %s1455_s3 = inlined_call_operand.<no memory space> [shape: f32[1], index: 3, kind: input, shape index: {}]   ;;  %s1456_s4 = inlined_call_operand.hbm [shape: f32[2,128], index: 4, kind: output, shape index: {}]  }
   0x1   :  { %11 = vsyncpa [#allocation7], 0 }
   0x2   :  { %12 = vsyncpa [#allocation5], 0  ;;  %s1347_s15 = smov [#allocation6]   ;;  %s1253_s19 = scalar_lea.hbm %s1453_s1, 8192 }
   0x3   :  { %s28_s16 = sshll.u32 %s1347_s15, 4  ;;  %p1254_p0 = scmp.ne.s32.totalorder %s1453_s1, %s1253_s19  ;;  %s29_s16 = int_to_ptr.vmem [resolvable:$true] %s28_s16 }
   0x4   :  { %p1257_p1 = scmp.lt.u32.totalorder %s1253_s19, %s1453_s1 }
   0x6   :  { %p1259_p2 = pnand %p1257_p1, %p1254_p0 }
   0x8   :  { %1262 = shalt.err (!%p1259_p2)
}
   0x9   :  { %s1263_s24 = scalar_lea.vmem %s29_s16, 8192  ;;  %p1268_p4 = scmp.lt.s32.totalorder %s29_s16, %s29_s16 }
   0xa   :  { %p1264_p3 = scmp.ne.s32.totalorder %s29_s16, %s1263_s24  ;;  %p1269_p5 = scmp.lt.s32.totalorder %s1263_s24, %s1263_s24 }
   0xc   :  { %p1270_p6 = por %p1269_p5, %p1268_p4 }
   0xe   :  { %p1271_p7 = pnand %p1270_p6, %p1264_p3 }
  0x10   :  { %1274 = shalt.err (!%p1271_p7)
}
  0x11   :  { %s1348_s25 = smov 64   ;;  %s1349_s26 = smov 4  }
  0x12   :  { %34 = dma.hbm_to_vmem [thread:$0]  %s1453_s1, 8192, %s29_s16, [#allocation7], %s1348_s25, %s1348_s25, %s1349_s26  }
  0x13   :  { %s1350_s29 = smov [#allocation3]   ;;  %s1351_s5 = smov [#allocation8]  }
  0x14   :  { %s19_s30 = sshll.u32 %s1350_s29, 4  ;;  %s40_s6 = sshll.u32 %s1351_s5, 4  ;;  %s20_s30 = int_to_ptr.vmem [resolvable:$true] %s19_s30  ;;  %s41_s6 = int_to_ptr.vmem [resolvable:$true] %s40_s6 }
  0x15   :  { %s1275_s9 = scalar_lea.hbm %s1452_s0, 128 }
  0x16   :  { %p1276_p8 = scmp.ne.s32.totalorder %s1452_s0, %s1275_s9  ;;  %p1279_p9 = scmp.lt.u32.totalorder %s1275_s9, %s1452_s0 }
  0x18   :  { %p1281_p10 = pnand %p1279_p9, %p1276_p8 }
  0x1a   :  { %1284 = shalt.err (!%p1281_p10)
}
  0x1b   :  { %s1285_s1 = scalar_lea.vmem %s20_s30, 128  ;;  %p1290_p12 = scmp.lt.s32.totalorder %s20_s30, %s20_s30 }
  0x1c   :  { %p1286_p11 = scmp.ne.s32.totalorder %s20_s30, %s1285_s1  ;;  %p1291_p13 = scmp.lt.s32.totalorder %s1285_s1, %s1285_s1 }
  0x1e   :  { %p1292_p0 = por %p1291_p13, %p1290_p12 }
  0x20   :  { %p1293_p1 = pnand %p1292_p0, %p1286_p11 }
  0x22   :  { %1296 = shalt.err (!%p1293_p1)
}
  0x23   :  { %22 = dma.hbm_to_vmem [thread:$0]  %s1452_s0, 128, %s20_s30, [#allocation4]  }
  0x24   :  { %s1297_s18 = scalar_lea.hbm %s1454_s2, 1024 }
  0x25   :  { %p1298_p2 = scmp.ne.s32.totalorder %s1454_s2, %s1297_s18  ;;  %p1301_p3 = scmp.lt.u32.totalorder %s1297_s18, %s1454_s2 }
  0x27   :  { %p1303_p4 = pnand %p1301_p3, %p1298_p2 }
  0x29   :  { %1306 = shalt.err (!%p1303_p4)
}
  0x2a   :  { %s1307_s23 = scalar_lea.vmem %s41_s6, 1024  ;;  %p1312_p6 = scmp.lt.s32.totalorder %s41_s6, %s41_s6 }
  0x2b   :  { %p1308_p5 = scmp.ne.s32.totalorder %s41_s6, %s1307_s23  ;;  %p1313_p7 = scmp.lt.s32.totalorder %s1307_s23, %s1307_s23 }
  0x2d   :  { %p1314_p8 = por %p1313_p7, %p1312_p6 }
  0x2f   :  { %p1315_p9 = pnand %p1314_p8, %p1308_p5 }
  0x31   :  { %1318 = shalt.err (!%p1315_p9)
}
  0x32   :  { %46 = dma.hbm_to_vmem [thread:$0]  %s1454_s2, 1024, %s41_s6, [#allocation7], %s1348_s25, %s1348_s25, %s1349_s26  }
  0x33   :  { %1341 = dma.done.wait [#allocation4], 128  }
  0x34   :  { %1342 = vsyncadd [#allocation4], 4294967168 }
  0x35   :  { %1343 = dma.done.wait [#allocation7], 9216  }
  0x36   :  { %1344 = vsyncadd [#allocation7], 4294958080  ;;  %v1188_v0 = vld [vmem:[#allocation6 + $0x40] sm:$0xff]   ;;  %v1192_v4 = vld [vmem:[#allocation6 + $0x48] sm:$0xff]   ;;  %v1352_v22 = vmov 1966171168   ;;  %v193_v24 = vlaneseq }
  0x37   :  { %v1189_v1 = vld [vmem:[#allocation6 + $0xc0] sm:$0xff]   ;;  %1014 = vmatprep.subr.bf16.mxu0 %v1188_v0  ;;  %v1193_v5 = vld [vmem:[#allocation6 + $0xc8] sm:$0xff]   ;;  %v1196_v8 = vld [vmem:[#allocation6 + $0x50] sm:$0xff]   ;;  %v191_v23 = vunpack.c.l.s4 %v1352_v22  ;;  %vm1354_vm0 = vmmov 0   ;;  %s1356_s26 = smov [#allocation9]  }
  0x38   :  { %v1190_v2 = vld [vmem:[#allocation6] sm:$0xff]   ;;  %1036 = vmatprep.subr.bf16.mxu1 %v1189_v1  ;;  %v1194_v6 = vld [vmem:[#allocation6 + $0x8] sm:$0xff]   ;;  %v1197_v9 = vld [vmem:[#allocation6 + $0xd0] sm:$0xff]   ;;  %v194_v30 = vshrl.u32 %v193_v24, 7  ;;  %s901_s27 = sshll.u32 %s1356_s26, 4  ;;  %s902_s27 = int_to_ptr.vmem [resolvable:$true] %s901_s27 }
  0x39   :  { %v1191_v3 = vld [vmem:[#allocation6 + $0x80] sm:$0xff]   ;;  %1015 = vmatpush3.bf16.msra.mxu0 %v1190_v2  ;;  %v1195_v7 = vld [vmem:[#allocation6 + $0x88] sm:$0xff]   ;;  %v1198_v10 = vld [vmem:[#allocation6 + $0x10] sm:$0xff]   ;;  %v192_v29 = vunpack.c.0.s8 %v191_v23  ;;  %s1319_s28 = scalar_lea.vmem %s902_s27, 32  ;;  %p1324_p11 = scmp.lt.s32.totalorder %s902_s27, %s902_s27 }
  0x3a   :  { %1037 = vmatpush3.bf16.msra.mxu1 %v1191_v3  ;;  %1016 = vmatprep.subr.bf16.mxu0 %v1192_v4  ;;  %v1199_v11 = vld [vmem:[#allocation6 + $0x90] sm:$0xff]   ;;  %v1200_v12 = vld [vmem:[#allocation6 + $0x58] sm:$0xff]   ;;  %v1204_v16 = vld [vmem:[#allocation6 + $0x60] sm:$0xff]   ;;  %p1320_p10 = scmp.ne.s32.totalorder %s902_s27, %s1319_s28  ;;  %p1325_p12 = scmp.lt.s32.totalorder %s1319_s28, %s1319_s28 }
  0x3b   :  { %1038 = vmatprep.subr.bf16.mxu1 %v1193_v5  ;;  %v1201_v13 = vld [vmem:[#allocation6 + $0xd8] sm:$0xff]   ;;  %v1205_v17 = vld [vmem:[#allocation6 + $0xe0] sm:$0xff]   ;;  %v1208_v20 = vld [vmem:[#allocation6 + $0x68] sm:$0xff]   ;;  %v1424_v35 = vsub.s32 %v192_v29, %v194_v30  ;;  %v1355_v29 = vmov 0.0  }
  0x3c   :  { %v1202_v14 = vld [vmem:[#allocation6 + $0x18] sm:$0xff]   ;;  %v1206_v18 = vld [vmem:[#allocation6 + $0x20] sm:$0xff]   ;;  %v1209_v21 = vld [vmem:[#allocation6 + $0xe8] sm:$0xff]   ;;  %p1326_p13 = por %p1325_p12, %p1324_p11 }
  0x3d   :  { %1017 = vmatpush3.bf16.msra.mxu0 %v1194_v6  ;;  %v1203_v15 = vld [vmem:[#allocation6 + $0x98] sm:$0xff]   ;;  %v1207_v19 = vld [vmem:[#allocation6 + $0xa0] sm:$0xff]   ;;  %v1210_v25 = vld [vmem:[#allocation6 + $0x28] sm:$0xff]  }
  0x3e   :  { %1039 = vmatpush3.bf16.msra.mxu1 %v1195_v7  ;;  %1018 = vmatprep.subr.bf16.mxu0 %v1196_v8  ;;  %v1211_v26 = vld [vmem:[#allocation6 + $0xa8] sm:$0xff]   ;;  %v1212_v27 = vld [vmem:[#allocation6 + $0x70] sm:$0xff]   ;;  %v1216_v33 = vld [vmem:[#allocation6 + $0x78] sm:$0xff]   ;;  %p1327_p0 = pnand %p1326_p13, %p1320_p10 }
  0x3f   :  { %1040 = vmatprep.subr.bf16.mxu1 %v1197_v9  ;;  %v1213_v28 = vld [vmem:[#allocation6 + $0xf0] sm:$0xff]   ;;  %v1217_v34 = vld [vmem:[#allocation6 + $0xf8] sm:$0xff]   ;;  %v1221_v41 = vld [vmem:[#allocation6 + $0x140] sm:$0xff]  }
  0x40   :  { %v1214_v31 = vld [vmem:[#allocation6 + $0x30] sm:$0xff]   ;;  %v1218_v36 = vld [vmem:[#allocation6 + $0x38] sm:$0xff]   ;;  %v1222_v42 = vld [vmem:[#allocation6 + $0x1c0] sm:$0xff]  }
  0x41   :  { %1019 = vmatpush3.bf16.msra.mxu0 %v1198_v10  ;;  %v1215_v32 = vld [vmem:[#allocation6 + $0xb0] sm:$0xff]   ;;  %v1219_v37 = vld [vmem:[#allocation6 + $0xb8] sm:$0xff]   ;;  %v1223_v47 = vld [vmem:[#allocation6 + $0x100] sm:$0xff]  }
  0x42   :  { %1041 = vmatpush3.bf16.msra.mxu1 %v1199_v11  ;;  %1020 = vmatprep.subr.bf16.mxu0 %v1200_v12  ;;  %v59_v38 = vld [vmem:[#allocation3] sm:$0xff]  ;;  %v1225_v50 = vld [vmem:[#allocation6 + $0x148] sm:$0xff]   ;;  %v1224_v52 = vld [vmem:[#allocation6 + $0x180] sm:$0xff]  }
  0x43   :  { %1042 = vmatprep.subr.bf16.mxu1 %v1201_v13  ;;  %v189_v39 = vcombine.high %v59_v38, %v59_v38  ;;  %v196_v40 = vrot.slane %v59_v38, %v1424_v35  ;;  %v1226_v54 = vld [vmem:[#allocation6 + $0x1c8] sm:$0xff]   ;;  %v1229_v57 = vld [vmem:[#allocation6 + $0x150] sm:$0xff]   ;;  %v1233_v61 = vld [vmem:[#allocation6 + $0x158] sm:$0xff]  }
  0x44   :  { %v1227_v55 = vld [vmem:[#allocation6 + $0x108] sm:$0xff]   ;;  %v1230_v59 = vld [vmem:[#allocation6 + $0x1d0] sm:$0xff]   ;;  %v1234_v63 = vld [vmem:[#allocation6 + $0x1d8] sm:$0xff]  }
  0x45   :  { %1021 = vmatpush3.bf16.msra.mxu0 %v1202_v14  ;;  %v204_v43 = vcombine.high %v196_v40, %v196_v40  ;;  %v212_v44 = vrot.slane %v196_v40, %v1424_v35  ;;  %v1429_v45 = vrot.slane %v189_v39, %v1424_v35  ;;  %v1228_v58 = vld [vmem:[#allocation6 + $0x188] sm:$0xff]   ;;  %v1231_v60 = vld [vmem:[#allocation6 + $0x110] sm:$0xff]   ;;  %v1235_v0 = vld [vmem:[#allocation6 + $0x118] sm:$0xff]  }
  0x46   :  { %1043 = vmatpush3.bf16.msra.mxu1 %v1203_v15  ;;  %1022 = vmatprep.subr.bf16.mxu0 %v1204_v16  ;;  %v1232_v62 = vld [vmem:[#allocation6 + $0x190] sm:$0xff]   ;;  %v1237_v1 = vld [vmem:[#allocation6 + $0x160] sm:$0xff]   ;;  %v1236_v2 = vld [vmem:[#allocation6 + $0x198] sm:$0xff]  }
  0x47   :  { %1044 = vmatprep.subr.bf16.mxu1 %v1205_v17  ;;  %v226_v46 = vrot.slane %v204_v43, %v1424_v35  ;;  %v205_v48 = vcombine.high %v1429_v45, %v1429_v45  ;;  %v234_v49 = vcombine.high %v212_v44, %v212_v44  ;;  %v1238_v3 = vld [vmem:[#allocation6 + $0x1e0] sm:$0xff]   ;;  %v1241_v5 = vld [vmem:[#allocation6 + $0x168] sm:$0xff]   ;;  %v1245_v9 = vld [vmem:[#allocation6 + $0x170] sm:$0xff]   ;;  %v219_v17 = vrot.slane %v1429_v45, %v1424_v35 }
  0x48   :  { %v1239_v4 = vld [vmem:[#allocation6 + $0x120] sm:$0xff]   ;;  %v1242_v7 = vld [vmem:[#allocation6 + $0x1e8] sm:$0xff]   ;;  %v1246_v11 = vld [vmem:[#allocation6 + $0x1f0] sm:$0xff]  }
  0x49   :  { %1023 = vmatpush3.bf16.msra.mxu0 %v1206_v18  ;;  %662 = vmatprep.mubr.bf16.mxu0 %v226_v46  ;;  %v236_v51 = vcombine.high %v226_v46, %v226_v46  ;;  %v233_v53 = vrot.slane %v205_v48, %v1424_v35  ;;  %v1240_v6 = vld [vmem:[#allocation6 + $0x1a0] sm:$0xff]   ;;  %v1243_v8 = vld [vmem:[#allocation6 + $0x128] sm:$0xff]   ;;  %v1247_v12 = vld [vmem:[#allocation6 + $0x130] sm:$0xff]  }
  0x4a   :  { %1045 = vmatpush3.bf16.msra.mxu1 %v1207_v19  ;;  %1024 = vmatprep.subr.bf16.mxu0 %v1208_v20  ;;  %v1244_v10 = vld [vmem:[#allocation6 + $0x1a8] sm:$0xff]   ;;  %v1249_v13 = vld [vmem:[#allocation6 + $0x178] sm:$0xff]   ;;  %v1248_v14 = vld [vmem:[#allocation6 + $0x1b0] sm:$0xff]   ;;  %v235_v19 = vcombine.high %v219_v17, %v219_v17 }
  0x4b   :  { %1046 = vmatprep.subr.bf16.mxu1 %v1209_v21  ;;  %702 = vmatprep.mubr.bf16.mxu1 %v236_v51  ;;  %v237_v56 = vcombine.high %v233_v53, %v233_v53  ;;  %v1250_v15 = vld [vmem:[#allocation6 + $0x1f8] sm:$0xff]   ;;  %v976_v20 = vld [vmem:[#allocation8] sm:$0xff]   ;;  %v1353_v21 = vmov 0.0|0.0   ;;  %v1007_v22 = vld [vmem:[#allocation8 + $0x8] sm:$0xff]  }
  0x4c   :  { %v1251_v16 = vld [vmem:[#allocation6 + $0x138] sm:$0xff]   ;;  %v1008_v23 = vld [vmem:[#allocation8 + $0x10] sm:$0xff]  }
  0x4d   :  { %1025 = vmatpush3.bf16.msra.mxu0 %v1210_v25  ;;  %v1252_v18 = vld [vmem:[#allocation6 + $0x1b8] sm:$0xff]   ;;  %v1010_v25 = vld [vmem:[#allocation8 + $0x20] sm:$0xff]  }
  0x4e   :  { %1047 = vmatpush3.bf16.msra.mxu1 %v1211_v26  ;;  %1026 = vmatprep.subr.bf16.mxu0 %v1212_v27  ;;  %v1009_v24 = vld [vmem:[#allocation8 + $0x18] sm:$0xff]   ;;  %v1011_v26 = vld [vmem:[#allocation8 + $0x28] sm:$0xff]   ;;  %v1012_v27 = vld [vmem:[#allocation8 + $0x30] sm:$0xff]  }
  0x4f   :  { %1048 = vmatprep.subr.bf16.mxu1 %v1213_v28  ;;  %v1013_v28 = vld [vmem:[#allocation8 + $0x38] sm:$0xff]  }
  0x51   :  { %1027 = vmatpush3.bf16.msra.mxu0 %v1214_v31 }
  0x52   :  { %1049 = vmatpush3.bf16.msra.mxu1 %v1215_v32  ;;  %1028 = vmatprep.subr.bf16.mxu0 %v1216_v33 }
  0x53   :  { %1050 = vmatprep.subr.bf16.mxu1 %v1217_v34 }
  0x55   :  { %1029 = vmatpush3.bf16.msra.mxu0 %v1218_v36 }
  0x56   :  { %1051 = vmatpush3.bf16.msra.mxu1 %v1219_v37  ;;  %1058 = vmatprep.subr.bf16.mxu0 %v1221_v41 }
  0x57   :  { %1080 = vmatprep.subr.bf16.mxu1 %v1222_v42 }
  0x58   :  { %663 = vmatmul.mubr.bf16.vlgmr.msra.gmra.mrb[0].mxu0 %v212_v44 }
  0x59   :  { %1059 = vmatpush3.bf16.msra.mxu0 %v1223_v47  ;;  %703 = vmatmul.mubr.bf16.vlgmr.msra.gmra.mrb[0].mxu1 %v234_v49 }
  0x5a   :  { %1060 = vmatprep.subr.bf16.mxu0 %v1225_v50  ;;  %1081 = vmatpush3.bf16.msra.mxu1 %v1224_v52 }
  0x5b   :  { %742 = vmatprep.mubr.bf16.mxu0 %v233_v53  ;;  %1082 = vmatprep.subr.bf16.mxu1 %v1226_v54  ;;  %v823_v53 = vstv %s1455_s3 }
  0x5c   :  { %782 = vmatprep.mubr.bf16.mxu1 %v237_v56 }
  0x5d   :  { %1061 = vmatpush3.bf16.msra.mxu0 %v1227_v55 }
  0x5e   :  { %1062 = vmatprep.subr.bf16.mxu0 %v1229_v57  ;;  %1083 = vmatpush3.bf16.msra.mxu1 %v1228_v58 }
  0x5f   :  { %1084 = vmatprep.subr.bf16.mxu1 %v1230_v59 }
  0x61   :  { %1063 = vmatpush3.bf16.msra.mxu0 %v1231_v60 }
  0x62   :  { %1064 = vmatprep.subr.bf16.mxu0 %v1233_v61  ;;  %1085 = vmatpush3.bf16.msra.mxu1 %v1232_v62 }
  0x63   :  { %1086 = vmatprep.subr.bf16.mxu1 %v1234_v63 }
  0x65   :  { %1065 = vmatpush3.bf16.msra.mxu0 %v1235_v0 }
  0x66   :  { %1066 = vmatprep.subr.bf16.mxu0 %v1237_v1  ;;  %1087 = vmatpush3.bf16.msra.mxu1 %v1236_v2 }
  0x67   :  { %1088 = vmatprep.subr.bf16.mxu1 %v1238_v3 }
  0x69   :  { %1067 = vmatpush3.bf16.msra.mxu0 %v1239_v4 }
  0x6a   :  { %1068 = vmatprep.subr.bf16.mxu0 %v1241_v5  ;;  %1089 = vmatpush3.bf16.msra.mxu1 %v1240_v6 }
  0x6b   :  { %1090 = vmatprep.subr.bf16.mxu1 %v1242_v7 }
  0x6d   :  { %1069 = vmatpush3.bf16.msra.mxu0 %v1243_v8 }
  0x6e   :  { %1070 = vmatprep.subr.bf16.mxu0 %v1245_v9  ;;  %1091 = vmatpush3.bf16.msra.mxu1 %v1244_v10 }
  0x6f   :  { %1092 = vmatprep.subr.bf16.mxu1 %v1246_v11 }
  0x71   :  { %1071 = vmatpush3.bf16.msra.mxu0 %v1247_v12 }
  0x72   :  { %1072 = vmatprep.subr.bf16.mxu0 %v1249_v13  ;;  %1093 = vmatpush3.bf16.msra.mxu1 %v1248_v14 }
  0x73   :  { %1094 = vmatprep.subr.bf16.mxu1 %v1250_v15 }
  0x75   :  { %1073 = vmatpush3.bf16.msra.mxu0 %v1251_v16 }
  0x76   :  { %1095 = vmatpush3.bf16.msra.mxu1 %v1252_v18  ;;  %1154 = vmatprep.subr.bf16.mxu0 %v1353_v21 }
  0x78   :  { %743 = vmatmul.mubr.bf16.vlgmr.msra.gmra.mrb[4].mxu0 %v219_v17 }
  0x79   :  { %783 = vmatmul.mubr.bf16.vlgmr.msra.gmra.mrb[4].mxu1 %v235_v19  ;;  %1156 = vmatpush3.bf16.msra.mxu0 %v976_v20 }
  0x7a   :  { %1157 = vmatprep.subr.bf16.mxu0 %v1353_v21  ;;  %1151 = vmatprep.mubr.msk.f32.mxu0 %vm1354_vm0, %v1355_v29 }
  0x7d   :  { %1159 = vmatpush3.bf16.msra.mxu0 %v1007_v22 }
  0x7e   :  { %1160 = vmatprep.subr.bf16.mxu0 %v1353_v21 }
  0x81   :  { %1162 = vmatpush3.bf16.msra.mxu0 %v1008_v23 }
  0x82   :  { %1163 = vmatprep.subr.bf16.mxu0 %v1353_v21 }
  0x85   :  { %1165 = vmatpush3.bf16.msra.mxu0 %v1009_v24 }
  0x86   :  { %1166 = vmatprep.subr.bf16.mxu0 %v1353_v21 }
  0x89   :  { %1168 = vmatpush3.bf16.msra.mxu0 %v1010_v25 }
  0x8a   :  { %1169 = vmatprep.subr.bf16.mxu0 %v1353_v21 }
  0x8d   :  { %1171 = vmatpush3.bf16.msra.mxu0 %v1011_v26 }
  0x8e   :  { %1172 = vmatprep.subr.bf16.mxu0 %v1353_v21 }
  0x91   :  { %1174 = vmatpush3.bf16.msra.mxu0 %v1012_v27 }
  0x92   :  { %1175 = vmatprep.subr.bf16.mxu0 %v1353_v21 }
  0x95   :  { %1177 = vmatpush3.bf16.msra.mxu0 %v1013_v28 }
 0x12b   :  { %v1030_v30 = vpop.f32.mrb[0].mxu0 }
 0x12c   :  { %v1031_v31 = vpop.f32.mrb[1].mxu0  ;;  %v1052_v32 = vpop.f32.mrb[0].mxu1 }
 0x12d   :  { %v1032_v33 = vadd.f32 %v1031_v31, %v1030_v30  ;;  %v1033_v34 = vpop.f32.mrb[2].mxu0  ;;  %v1053_v35 = vpop.f32.mrb[1].mxu1 }
 0x12e   :  { %v1034_v36 = vpop.f32.mrb[3].mxu0  ;;  %v1054_v37 = vadd.f32 %v1053_v35, %v1052_v32  ;;  %v1055_v38 = vpop.f32.mrb[2].mxu1 }
 0x12f   :  { %v1056_v39 = vpop.f32.mrb[3].mxu1 }
 0x130   :  { %v705_v40 = vadd.f32 %v1054_v37, %v1032_v33 }
 0x14b   :  { %v1074_v41 = vpop.f32.mrb[4].mxu0 }
 0x14c   :  { %v1075_v42 = vpop.f32.mrb[5].mxu0  ;;  %v1096_v43 = vpop.f32.mrb[4].mxu1 }
 0x14d   :  { %v1076_v44 = vadd.f32 %v1075_v42, %v1074_v41  ;;  %v1077_v45 = vpop.f32.mrb[6].mxu0  ;;  %v1097_v46 = vpop.f32.mrb[5].mxu1 }
 0x14e   :  { %v1078_v47 = vpop.f32.mrb[7].mxu0  ;;  %v1098_v49 = vadd.f32 %v1097_v46, %v1096_v43  ;;  %v1099_v50 = vpop.f32.mrb[6].mxu1 }
 0x14f   :  { %v745_v48 = vadd.f32 %v1076_v44, %v705_v40  ;;  %v1100_v51 = vpop.f32.mrb[7].mxu1 }
 0x151   :  { %v785_v52 = vadd.f32 %v1098_v49, %v745_v48 }
 0x153   :  { %1152 = vmatmul.mubr.f32.vlgmr.msra.gmra.mrb[8].mxu0 %v785_v52 }
 0x226   :  { %v890_v54 = vpop.f32.mrb[8].mxu0 }
 0x227   :  { %v891_v55 = vadd.f32 %v890_v54, %v823_v53  ;;  %v1153_v56 = vpop.f32.mrb[9].mxu0 }
 0x229   :  { %894 = vst [vmem:[#allocation9] sm:$0x3] %v891_v55 }
 0x22a   :  { %1330 = shalt.err (!%p1327_p0)
}
 0x22b   :  { %s1331_s5 = scalar_lea.hbm %s1456_s4, 32 }
 0x22c   :  { %p1332_p1 = scmp.ne.s32.totalorder %s1456_s4, %s1331_s5  ;;  %p1335_p2 = scmp.lt.u32.totalorder %s1331_s5, %s1456_s4 }
 0x22e   :  { %p1337_p3 = pnand %p1335_p2, %p1332_p1 }
 0x230   :  { %1340 = shalt.err (!%p1337_p3)
}
 0x231   :  { %904 = dma.vmem_to_hbm [thread:$0]  %s902_s27, 32, %s1456_s4, [#allocation5]  }
 0x232   :  { %1345 = dma.done.wait [#allocation5], 32  }
 0x233   :  { %1346 = vsyncadd [#allocation5], 4294967264 }
 0x234   :  { %908 = vsyncpa [#allocation4], 1 }
 0x235   :  { %909 = vsyncpa [#allocation7], 1 }
 0x236   :  { %910 = vsyncpa [#allocation5], 1 }

</bundles_post_ra>
